<compile_context>
chip_gen: v7x
topology: tpu7x:2x2x1
jax: 0.10.0
libtpu: 0.0.40
codegen_flags: <defaults>
</compile_context>

<pallas_src>
import functools

import jax
import jax.numpy as jnp
from jax import lax
from jax.experimental import pallas as pl
from jax.experimental.pallas import tpu as pltpu

KERNEL_SET = (2, 3, 6, 7)


def _round_up(x, m):
    return ((x + m - 1) // m) * m


def _dilated_inception_kernel(x_ref, w_ref, b_ref, o_ref, *,
                              dilation, t_out, k_max):
    # x_ref : (T, Cin_p, R)          rows-in-lanes input tile
    # w_ref : (Cout_p, k_max*Cin_p)  tap-folded combined weight
    # b_ref : (Cout_p, 1)            concatenated bias (f32)
    # o_ref : (T_out, Cout_p, R)
    w = w_ref[...]
    b = b_ref[...].astype(jnp.float32)
    for t in range(t_out):
        # Fold the 7 dilated taps into the MXU K dimension: gather the k_max
        # input planes for this output step and collapse (k_max, Cin_p) -> K.
        xs = jnp.concatenate(
            [x_ref[t + m * dilation] for m in range(k_max)], axis=0)
        # One wide matmul per output step: (Cout_p, K) x (K, R) -> (Cout_p, R),
        # f32 accumulation on the MXU, bias folded in, lane-dense store.
        y = jnp.dot(w, xs, preferred_element_type=jnp.float32) + b
        o_ref[t] = y.astype(o_ref.dtype)


def _choose_row_tile(rows, t, t_out, cin_p, cout_p, itemsize, budget):
    rows128 = _round_up(rows, 128)
    # Bytes per row (per lane) that must be VMEM resident: double-buffered
    # input and output blocks plus the per-step tap-gather staging.  With
    # rows-in-lanes there is no 128-lane padding waste; cin_p/cout_p are
    # already sublane (8) padded.
    per_row = (2 * (t * cin_p + t_out * cout_p)
               + KERNEL_SET[-1] * cin_p) * itemsize
    rt = budget // max(per_row, 1)
    rt = max(128, (rt // 128) * 128)
    rt = min(rt, rows128, 4096)
    # Keep >= 2 grid steps when there are enough rows, so v7x's two
    # TensorCores both get work under dimension_semantics=("parallel",).
    if rows128 >= 256:
        rt = min(rt, max(128, ((rows128 // 2) // 128) * 128))
    return int(rt)


def dilated_inception_pallas(x_nchw, weights, biases, dilation_factor=2,
                             row_tile=None, compute_dtype=None):
    """x_nchw: (B, Cin, N, T); weights: list of (Cout_part, Cin, 1, k);
    biases: list of (Cout_part,).  Returns (B, Cout, N, T_out)."""
    B, Cin, N, T = x_nchw.shape
    n_branch = len(KERNEL_SET)
    cout_part = weights[0].shape[0]
    Cout = cout_part * n_branch
    k_max = KERNEL_SET[-1]
    T_out = T - dilation_factor * (k_max - 1)
    if T_out <= 0:
        raise ValueError("sequence too short for largest dilated kernel")

    out_dtype = x_nchw.dtype
    cdt = jnp.dtype(compute_dtype) if compute_dtype is not None else jnp.dtype(out_dtype)
    itemsize = cdt.itemsize

    Cin_p = _round_up(Cin, 8)     # sublane-pad channels so reshapes are free
    Cout_p = _round_up(Cout, 8)
    K_total = k_max * Cin_p
    rows = B * N

    # Generation-aware VMEM capacity (per TensorCore).
    try:
        info = pltpu.get_tpu_info()
        vmem_cap = int(getattr(info, "vmem_capacity_bytes", 64 << 20))
    except Exception:
        vmem_cap = 64 << 20       # conservative (v7x per-core)
    vmem_cap = max(vmem_cap, 32 << 20)

    if row_tile is None:
        # ~25 MiB block budget on v7x (64 MiB), 32 MiB on v5e/v6e (128 MiB).
        budget = min(int(0.4 * vmem_cap), 32 << 20)
        row_tile = _choose_row_tile(rows, T, T_out, Cin_p, Cout_p, itemsize,
                                    budget)
    row_tile = max(128, (row_tile // 128) * 128)
    rows_padded = _round_up(rows, row_tile)

    # NCHW -> rows-in-lanes (T, Cin_p, rows_padded).
    x_lay = jnp.transpose(x_nchw, (3, 1, 0, 2)).reshape(T, Cin, rows)
    x_lay = jnp.pad(x_lay, ((0, 0), (0, Cin_p - Cin), (0, rows_padded - rows)))
    x_lay = x_lay.astype(cdt)

    # Fuse the four branches into one zero-padded 7-tap weight and flatten the
    # taps into the K dimension: W_flat[o, m*Cin_p + c] = W_comb[m, c, o].
    # Branch with kernel size k (truncated to the last T_out steps) only
    # touches tap positions m >= k_max - k.
    w_comb = jnp.zeros((k_max, Cin_p, Cout_p), dtype=jnp.float32)
    for b_idx, (w, k) in enumerate(zip(weights, KERNEL_SET)):
        w_t = jnp.transpose(w[:, :, 0, :], (2, 1, 0)).astype(jnp.float32)
        c0 = b_idx * cout_part
        w_comb = w_comb.at[k_max - k:, :Cin, c0:c0 + cout_part].set(w_t)
    w_flat = jnp.transpose(w_comb, (2, 0, 1)).reshape(Cout_p, K_total).astype(cdt)

    bias_full = (jnp.zeros((Cout_p,), jnp.float32)
                 .at[:Cout].set(jnp.concatenate(biases, axis=0).astype(jnp.float32))
                 .reshape(Cout_p, 1))

    kernel = functools.partial(_dilated_inception_kernel,
                               dilation=dilation_factor, t_out=T_out,
                               k_max=k_max)
    grid = (rows_padded // row_tile,)

    # Self-consistent VMEM accounting (same numbers that chose row_tile).
    x_block = T * Cin_p * row_tile * itemsize
    o_block = T_out * Cout_p * row_tile * itemsize
    w_bytes = Cout_p * _round_up(K_total, 128) * itemsize
    b_bytes = Cout_p * 128 * 4
    gather_tmp = K_total * row_tile * itemsize
    footprint = 2 * (x_block + o_block) + w_bytes + b_bytes + 2 * gather_tmp
    vmem_limit = max(footprint + (8 << 20), 32 << 20)
    vmem_limit = min(vmem_limit, int(0.9 * vmem_cap))
    vmem_limit = int(max(vmem_limit, footprint + (2 << 20)))

    def _run(single_buffer_invariants):
        inv_kw = ({"pipeline_mode": pl.Buffered(1)}
                  if single_buffer_invariants else {})
        return pl.pallas_call(
            kernel,
            out_shape=jax.ShapeDtypeStruct((T_out, Cout_p, rows_padded),
                                           out_dtype),
            grid_spec=pltpu.PrefetchScalarGridSpec(
                num_scalar_prefetch=0,
                grid=grid,
                in_specs=[
                    pl.BlockSpec((T, Cin_p, row_tile), lambda i: (0, 0, i)),
                    pl.BlockSpec((Cout_p, K_total), lambda i: (0, 0), **inv_kw),
                    pl.BlockSpec((Cout_p, 1), lambda i: (0, 0), **inv_kw),
                ],
                out_specs=pl.BlockSpec((T_out, Cout_p, row_tile),
                                       lambda i: (0, 0, i)),
            ),
            compiler_params=pltpu.CompilerParams(
                dimension_semantics=("parallel",),
                vmem_limit_bytes=vmem_limit),
        )(x_lay, w_flat, bias_full)

    try:
        out_lay = _run(True)
    except Exception:
        # Fallback for JAX versions without BlockSpec(pipeline_mode=...).
        out_lay = _run(False)

    # (T_out, Cout_p, rows_padded) -> (B, Cout, N, T_out)
    out = out_lay[:, :Cout, :rows].reshape(T_out, Cout, B, N)
    return jnp.transpose(out, (2, 1, 3, 0))


def dilated_inception_reference(x_nchw, weights, biases, dilation_factor=2):
    """Plain-JAX reference matching the PyTorch forward."""
    outs = []
    for w, b in zip(weights, biases):
        y = lax.conv_general_dilated(
            x_nchw.astype(jnp.float32), w.astype(jnp.float32),
            window_strides=(1, 1), padding="VALID",
            rhs_dilation=(1, dilation_factor),
            dimension_numbers=("NCHW", "OIHW", "NCHW"))
        y = y + b.astype(jnp.float32)[None, :, None, None]
        outs.append(y)
    t_out = outs[-1].shape[-1]
    outs = [o[..., -t_out:] for o in outs]
    return jnp.concatenate(outs, axis=1)


if __name__ == "__main__":
    # Small shapes consistent with the module: Cout divisible by 4.
    B, Cin, N, T = 2, 8, 16, 16
    Cout = 16
    dilation = 2
    cout_part = Cout // len(KERNEL_SET)

    key = jax.random.PRNGKey(0)
    keys = jax.random.split(key, 1 + 2 * len(KERNEL_SET))
    x = jax.random.normal(keys[0], (B, Cin, N, T), dtype=jnp.float32)

    weights, biases = [], []
    for idx, k in enumerate(KERNEL_SET):
        wk = jax.random.normal(keys[1 + 2 * idx], (cout_part, Cin, 1, k),
                               dtype=jnp.float32) * 0.1
        bk = jax.random.normal(keys[2 + 2 * idx], (cout_part,),
                               dtype=jnp.float32) * 0.1
        weights.append(wk)
        biases.append(bk)

    out = dilated_inception_pallas(x, weights, biases,
                                   dilation_factor=dilation)
    out = jax.block_until_ready(out)

    ref = dilated_inception_reference(x, weights, biases,
                                      dilation_factor=dilation)
    assert out.shape == ref.shape, (out.shape, ref.shape)
    assert jnp.allclose(out, ref, atol=1e-4, rtol=1e-4), "mismatch vs reference"

    print("KERNEL_OK")
</pallas_src>

<mosaic_0001>
module attributes {stable_mosaic.version = 11 : i64} {
  func.func @_dilated_inception_kernel(%arg0: i32, %arg1: memref<16x8x128xf32, #tpu.memory_space<vmem>>, %arg2: memref<16x56xf32, #tpu.memory_space<vmem>>, %arg3: memref<16x1xf32, #tpu.memory_space<vmem>>, %arg4: memref<4x16x128xf32, #tpu.memory_space<vmem>>) attributes {dimension_semantics = [#tpu.dimension_semantics<parallel>], iteration_bounds = array<i64: 1>, scalar_prefetch = 0 : i64, scratch_operands = 0 : i64, tpu.core_type = #tpu.core_type<tc>, window_params = [{transform_indices = @transform_0, window_bounds = array<i64: 16, 8, 128>}, {pipeline_mode = #tpu.pipeline_mode<synchronous>, transform_indices = @transform_1, window_bounds = array<i64: 16, 56>}, {pipeline_mode = #tpu.pipeline_mode<synchronous>, transform_indices = @transform_2, window_bounds = array<i64: 16, 1>}, {transform_indices = @transform_3, window_bounds = array<i64: 4, 16, 128>}]} {
    %c0 = arith.constant 0 : index
    %c0_0 = arith.constant 0 : index
    %0 = vector.load %arg2[%c0, %c0_0] : memref<16x56xf32, #tpu.memory_space<vmem>>, vector<16x56xf32>
    %c0_1 = arith.constant 0 : index
    %c0_2 = arith.constant 0 : index
    %1 = vector.load %arg3[%c0_1, %c0_2] : memref<16x1xf32, #tpu.memory_space<vmem>>, vector<16x1xf32>
    %c0_3 = arith.constant 0 : index
    %c0_4 = arith.constant 0 : index
    %c0_5 = arith.constant 0 : index
    %2 = vector.load %arg1[%c0_3, %c0_4, %c0_5] : memref<16x8x128xf32, #tpu.memory_space<vmem>>, vector<1x8x128xf32>
    %3 = vector.shape_cast %2 : vector<1x8x128xf32> to vector<8x128xf32>
    %c2 = arith.constant 2 : index
    %c0_6 = arith.constant 0 : index
    %c0_7 = arith.constant 0 : index
    %4 = vector.load %arg1[%c2, %c0_6, %c0_7] : memref<16x8x128xf32, #tpu.memory_space<vmem>>, vector<1x8x128xf32>
    %5 = vector.shape_cast %4 : vector<1x8x128xf32> to vector<8x128xf32>
    %c4 = arith.constant 4 : index
    %c0_8 = arith.constant 0 : index
    %c0_9 = arith.constant 0 : index
    %6 = vector.load %arg1[%c4, %c0_8, %c0_9] : memref<16x8x128xf32, #tpu.memory_space<vmem>>, vector<1x8x128xf32>
    %7 = vector.shape_cast %6 : vector<1x8x128xf32> to vector<8x128xf32>
    %c6 = arith.constant 6 : index
    %c0_10 = arith.constant 0 : index
    %c0_11 = arith.constant 0 : index
    %8 = vector.load %arg1[%c6, %c0_10, %c0_11] : memref<16x8x128xf32, #tpu.memory_space<vmem>>, vector<1x8x128xf32>
    %9 = vector.shape_cast %8 : vector<1x8x128xf32> to vector<8x128xf32>
    %c8 = arith.constant 8 : index
    %c0_12 = arith.constant 0 : index
    %c0_13 = arith.constant 0 : index
    %10 = vector.load %arg1[%c8, %c0_12, %c0_13] : memref<16x8x128xf32, #tpu.memory_space<vmem>>, vector<1x8x128xf32>
    %11 = vector.shape_cast %10 : vector<1x8x128xf32> to vector<8x128xf32>
    %c10 = arith.constant 10 : index
    %c0_14 = arith.constant 0 : index
    %c0_15 = arith.constant 0 : index
    %12 = vector.load %arg1[%c10, %c0_14, %c0_15] : memref<16x8x128xf32, #tpu.memory_space<vmem>>, vector<1x8x128xf32>
    %13 = vector.shape_cast %12 : vector<1x8x128xf32> to vector<8x128xf32>
    %c12 = arith.constant 12 : index
    %c0_16 = arith.constant 0 : index
    %c0_17 = arith.constant 0 : index
    %14 = vector.load %arg1[%c12, %c0_16, %c0_17] : memref<16x8x128xf32, #tpu.memory_space<vmem>>, vector<1x8x128xf32>
    %15 = vector.shape_cast %14 : vector<1x8x128xf32> to vector<8x128xf32>
    %16 = tpu.concatenate %3, %5, %7, %9, %11, %13, %15 in 0 : vector<8x128xf32>, vector<8x128xf32>, vector<8x128xf32>, vector<8x128xf32>, vector<8x128xf32>, vector<8x128xf32>, vector<8x128xf32> -> vector<56x128xf32>
    %cst = arith.constant dense<0.000000e+00> : vector<16x128xf32>
    %17 = tpu.matmul %0, %16, %cst {dimension_numbers = #tpu.dot_dimension_numbers<[1], [0], [0], [1], [0, 0, 1, 1], [], []>} : vector<16x56xf32>, vector<56x128xf32>, vector<16x128xf32> -> vector<16x128xf32>
    %18 = vector.broadcast %1 : vector<16x1xf32> to vector<16x128xf32>
    %19 = arith.addf %17, %18 : vector<16x128xf32>
    %c0_18 = arith.constant 0 : index
    %c0_19 = arith.constant 0 : index
    %c0_20 = arith.constant 0 : index
    %20 = vector.load %arg4[%c0_18, %c0_19, %c0_20] : memref<4x16x128xf32, #tpu.memory_space<vmem>>, vector<1x16x128xf32>
    %21 = vector.shape_cast %20 : vector<1x16x128xf32> to vector<16x128xf32>
    %22 = vector.shape_cast %19 : vector<16x128xf32> to vector<1x16x128xf32>
    tpu.vector_store %arg4[%c0_18, %c0_19, %c0_20], %22 {strides = array<i32>} : memref<4x16x128xf32, #tpu.memory_space<vmem>>, vector<1x16x128xf32>,
    %c1 = arith.constant 1 : index
    %c0_21 = arith.constant 0 : index
    %c0_22 = arith.constant 0 : index
    %23 = vector.load %arg1[%c1, %c0_21, %c0_22] : memref<16x8x128xf32, #tpu.memory_space<vmem>>, vector<1x8x128xf32>
    %24 = vector.shape_cast %23 : vector<1x8x128xf32> to vector<8x128xf32>
    %c3 = arith.constant 3 : index
    %c0_23 = arith.constant 0 : index
    %c0_24 = arith.constant 0 : index
    %25 = vector.load %arg1[%c3, %c0_23, %c0_24] : memref<16x8x128xf32, #tpu.memory_space<vmem>>, vector<1x8x128xf32>
    %26 = vector.shape_cast %25 : vector<1x8x128xf32> to vector<8x128xf32>
    %c5 = arith.constant 5 : index
    %c0_25 = arith.constant 0 : index
    %c0_26 = arith.constant 0 : index
    %27 = vector.load %arg1[%c5, %c0_25, %c0_26] : memref<16x8x128xf32, #tpu.memory_space<vmem>>, vector<1x8x128xf32>
    %28 = vector.shape_cast %27 : vector<1x8x128xf32> to vector<8x128xf32>
    %c7 = arith.constant 7 : index
    %c0_27 = arith.constant 0 : index
    %c0_28 = arith.constant 0 : index
    %29 = vector.load %arg1[%c7, %c0_27, %c0_28] : memref<16x8x128xf32, #tpu.memory_space<vmem>>, vector<1x8x128xf32>
    %30 = vector.shape_cast %29 : vector<1x8x128xf32> to vector<8x128xf32>
    %c9 = arith.constant 9 : index
    %c0_29 = arith.constant 0 : index
    %c0_30 = arith.constant 0 : index
    %31 = vector.load %arg1[%c9, %c0_29, %c0_30] : memref<16x8x128xf32, #tpu.memory_space<vmem>>, vector<1x8x128xf32>
    %32 = vector.shape_cast %31 : vector<1x8x128xf32> to vector<8x128xf32>
    %c11 = arith.constant 11 : index
    %c0_31 = arith.constant 0 : index
    %c0_32 = arith.constant 0 : index
    %33 = vector.load %arg1[%c11, %c0_31, %c0_32] : memref<16x8x128xf32, #tpu.memory_space<vmem>>, vector<1x8x128xf32>
    %34 = vector.shape_cast %33 : vector<1x8x128xf32> to vector<8x128xf32>
    %c13 = arith.constant 13 : index
    %c0_33 = arith.constant 0 : index
    %c0_34 = arith.constant 0 : index
    %35 = vector.load %arg1[%c13, %c0_33, %c0_34] : memref<16x8x128xf32, #tpu.memory_space<vmem>>, vector<1x8x128xf32>
    %36 = vector.shape_cast %35 : vector<1x8x128xf32> to vector<8x128xf32>
    %37 = tpu.concatenate %24, %26, %28, %30, %32, %34, %36 in 0 : vector<8x128xf32>, vector<8x128xf32>, vector<8x128xf32>, vector<8x128xf32>, vector<8x128xf32>, vector<8x128xf32>, vector<8x128xf32> -> vector<56x128xf32>
    %cst_35 = arith.constant dense<0.000000e+00> : vector<16x128xf32>
    %38 = tpu.matmul %0, %37, %cst_35 {dimension_numbers = #tpu.dot_dimension_numbers<[1], [0], [0], [1], [0, 0, 1, 1], [], []>} : vector<16x56xf32>, vector<56x128xf32>, vector<16x128xf32> -> vector<16x128xf32>
    %39 = vector.broadcast %1 : vector<16x1xf32> to vector<16x128xf32>
    %40 = arith.addf %38, %39 : vector<16x128xf32>
    %c1_36 = arith.constant 1 : index
    %c0_37 = arith.constant 0 : index
    %c0_38 = arith.constant 0 : index
    %41 = vector.load %arg4[%c1_36, %c0_37, %c0_38] : memref<4x16x128xf32, #tpu.memory_space<vmem>>, vector<1x16x128xf32>
    %42 = vector.shape_cast %41 : vector<1x16x128xf32> to vector<16x128xf32>
    %43 = vector.shape_cast %40 : vector<16x128xf32> to vector<1x16x128xf32>
    tpu.vector_store %arg4[%c1_36, %c0_37, %c0_38], %43 {strides = array<i32>} : memref<4x16x128xf32, #tpu.memory_space<vmem>>, vector<1x16x128xf32>,
    %c2_39 = arith.constant 2 : index
    %c0_40 = arith.constant 0 : index
    %c0_41 = arith.constant 0 : index
    %44 = vector.load %arg1[%c2_39, %c0_40, %c0_41] : memref<16x8x128xf32, #tpu.memory_space<vmem>>, vector<1x8x128xf32>
    %45 = vector.shape_cast %44 : vector<1x8x128xf32> to vector<8x128xf32>
    %c4_42 = arith.constant 4 : index
    %c0_43 = arith.constant 0 : index
    %c0_44 = arith.constant 0 : index
    %46 = vector.load %arg1[%c4_42, %c0_43, %c0_44] : memref<16x8x128xf32, #tpu.memory_space<vmem>>, vector<1x8x128xf32>
    %47 = vector.shape_cast %46 : vector<1x8x128xf32> to vector<8x128xf32>
    %c6_45 = arith.constant 6 : index
    %c0_46 = arith.constant 0 : index
    %c0_47 = arith.constant 0 : index
    %48 = vector.load %arg1[%c6_45, %c0_46, %c0_47] : memref<16x8x128xf32, #tpu.memory_space<vmem>>, vector<1x8x128xf32>
    %49 = vector.shape_cast %48 : vector<1x8x128xf32> to vector<8x128xf32>
    %c8_48 = arith.constant 8 : index
    %c0_49 = arith.constant 0 : index
    %c0_50 = arith.constant 0 : index
    %50 = vector.load %arg1[%c8_48, %c0_49, %c0_50] : memref<16x8x128xf32, #tpu.memory_space<vmem>>, vector<1x8x128xf32>
    %51 = vector.shape_cast %50 : vector<1x8x128xf32> to vector<8x128xf32>
    %c10_51 = arith.constant 10 : index
    %c0_52 = arith.constant 0 : index
    %c0_53 = arith.constant 0 : index
    %52 = vector.load %arg1[%c10_51, %c0_52, %c0_53] : memref<16x8x128xf32, #tpu.memory_space<vmem>>, vector<1x8x128xf32>
    %53 = vector.shape_cast %52 : vector<1x8x128xf32> to vector<8x128xf32>
    %c12_54 = arith.constant 12 : index
    %c0_55 = arith.constant 0 : index
    %c0_56 = arith.constant 0 : index
    %54 = vector.load %arg1[%c12_54, %c0_55, %c0_56] : memref<16x8x128xf32, #tpu.memory_space<vmem>>, vector<1x8x128xf32>
    %55 = vector.shape_cast %54 : vector<1x8x128xf32> to vector<8x128xf32>
    %c14 = arith.constant 14 : index
    %c0_57 = arith.constant 0 : index
    %c0_58 = arith.constant 0 : index
    %56 = vector.load %arg1[%c14, %c0_57, %c0_58] : memref<16x8x128xf32, #tpu.memory_space<vmem>>, vector<1x8x128xf32>
    %57 = vector.shape_cast %56 : vector<1x8x128xf32> to vector<8x128xf32>
    %58 = tpu.concatenate %45, %47, %49, %51, %53, %55, %57 in 0 : vector<8x128xf32>, vector<8x128xf32>, vector<8x128xf32>, vector<8x128xf32>, vector<8x128xf32>, vector<8x128xf32>, vector<8x128xf32> -> vector<56x128xf32>
    %cst_59 = arith.constant dense<0.000000e+00> : vector<16x128xf32>
    %59 = tpu.matmul %0, %58, %cst_59 {dimension_numbers = #tpu.dot_dimension_numbers<[1], [0], [0], [1], [0, 0, 1, 1], [], []>} : vector<16x56xf32>, vector<56x128xf32>, vector<16x128xf32> -> vector<16x128xf32>
    %60 = vector.broadcast %1 : vector<16x1xf32> to vector<16x128xf32>
    %61 = arith.addf %59, %60 : vector<16x128xf32>
    %c2_60 = arith.constant 2 : index
    %c0_61 = arith.constant 0 : index
    %c0_62 = arith.constant 0 : index
    %62 = vector.load %arg4[%c2_60, %c0_61, %c0_62] : memref<4x16x128xf32, #tpu.memory_space<vmem>>, vector<1x16x128xf32>
    %63 = vector.shape_cast %62 : vector<1x16x128xf32> to vector<16x128xf32>
    %64 = vector.shape_cast %61 : vector<16x128xf32> to vector<1x16x128xf32>
    tpu.vector_store %arg4[%c2_60, %c0_61, %c0_62], %64 {strides = array<i32>} : memref<4x16x128xf32, #tpu.memory_space<vmem>>, vector<1x16x128xf32>,
    %c3_63 = arith.constant 3 : index
    %c0_64 = arith.constant 0 : index
    %c0_65 = arith.constant 0 : index
    %65 = vector.load %arg1[%c3_63, %c0_64, %c0_65] : memref<16x8x128xf32, #tpu.memory_space<vmem>>, vector<1x8x128xf32>
    %66 = vector.shape_cast %65 : vector<1x8x128xf32> to vector<8x128xf32>
    %c5_66 = arith.constant 5 : index
    %c0_67 = arith.constant 0 : index
    %c0_68 = arith.constant 0 : index
    %67 = vector.load %arg1[%c5_66, %c0_67, %c0_68] : memref<16x8x128xf32, #tpu.memory_space<vmem>>, vector<1x8x128xf32>
    %68 = vector.shape_cast %67 : vector<1x8x128xf32> to vector<8x128xf32>
    %c7_69 = arith.constant 7 : index
    %c0_70 = arith.constant 0 : index
    %c0_71 = arith.constant 0 : index
    %69 = vector.load %arg1[%c7_69, %c0_70, %c0_71] : memref<16x8x128xf32, #tpu.memory_space<vmem>>, vector<1x8x128xf32>
    %70 = vector.shape_cast %69 : vector<1x8x128xf32> to vector<8x128xf32>
    %c9_72 = arith.constant 9 : index
    %c0_73 = arith.constant 0 : index
    %c0_74 = arith.constant 0 : index
    %71 = vector.load %arg1[%c9_72, %c0_73, %c0_74] : memref<16x8x128xf32, #tpu.memory_space<vmem>>, vector<1x8x128xf32>
    %72 = vector.shape_cast %71 : vector<1x8x128xf32> to vector<8x128xf32>
    %c11_75 = arith.constant 11 : index
    %c0_76 = arith.constant 0 : index
    %c0_77 = arith.constant 0 : index
    %73 = vector.load %arg1[%c11_75, %c0_76, %c0_77] : memref<16x8x128xf32, #tpu.memory_space<vmem>>, vector<1x8x128xf32>
    %74 = vector.shape_cast %73 : vector<1x8x128xf32> to vector<8x128xf32>
    %c13_78 = arith.constant 13 : index
    %c0_79 = arith.constant 0 : index
    %c0_80 = arith.constant 0 : index
    %75 = vector.load %arg1[%c13_78, %c0_79, %c0_80] : memref<16x8x128xf32, #tpu.memory_space<vmem>>, vector<1x8x128xf32>
    %76 = vector.shape_cast %75 : vector<1x8x128xf32> to vector<8x128xf32>
    %c15 = arith.constant 15 : index
    %c0_81 = arith.constant 0 : index
    %c0_82 = arith.constant 0 : index
    %77 = vector.load %arg1[%c15, %c0_81, %c0_82] : memref<16x8x128xf32, #tpu.memory_space<vmem>>, vector<1x8x128xf32>
    %78 = vector.shape_cast %77 : vector<1x8x128xf32> to vector<8x128xf32>
    %79 = tpu.concatenate %66, %68, %70, %72, %74, %76, %78 in 0 : vector<8x128xf32>, vector<8x128xf32>, vector<8x128xf32>, vector<8x128xf32>, vector<8x128xf32>, vector<8x128xf32>, vector<8x128xf32> -> vector<56x128xf32>
    %cst_83 = arith.constant dense<0.000000e+00> : vector<16x128xf32>
    %80 = tpu.matmul %0, %79, %cst_83 {dimension_numbers = #tpu.dot_dimension_numbers<[1], [0], [0], [1], [0, 0, 1, 1], [], []>} : vector<16x56xf32>, vector<56x128xf32>, vector<16x128xf32> -> vector<16x128xf32>
    %81 = vector.broadcast %1 : vector<16x1xf32> to vector<16x128xf32>
    %82 = arith.addf %80, %81 : vector<16x128xf32>
    %c3_84 = arith.constant 3 : index
    %c0_85 = arith.constant 0 : index
    %c0_86 = arith.constant 0 : index
    %83 = vector.load %arg4[%c3_84, %c0_85, %c0_86] : memref<4x16x128xf32, #tpu.memory_space<vmem>>, vector<1x16x128xf32>
    %84 = vector.shape_cast %83 : vector<1x16x128xf32> to vector<16x128xf32>
    %85 = vector.shape_cast %82 : vector<16x128xf32> to vector<1x16x128xf32>
    tpu.vector_store %arg4[%c3_84, %c0_85, %c0_86], %85 {strides = array<i32>} : memref<4x16x128xf32, #tpu.memory_space<vmem>>, vector<1x16x128xf32>,
    return
  }
  func.func @transform_0(%arg0: i32) -> (i32, i32, i32) {
    %c0_i32 = arith.constant 0 : i32
    %c0_i32_0 = arith.constant 0 : i32
    %c0_i32_1 = arith.constant 0 : i32
    return %c0_i32, %c0_i32_0, %arg0 : i32, i32, i32
  }
  func.func @transform_1(%arg0: i32) -> (i32, i32) {
    %c0_i32 = arith.constant 0 : i32
    %c0_i32_0 = arith.constant 0 : i32
    %c0_i32_1 = arith.constant 0 : i32
    return %c0_i32, %c0_i32_0 : i32, i32
  }
  func.func @transform_2(%arg0: i32) -> (i32, i32) {
    %c0_i32 = arith.constant 0 : i32
    %c0_i32_0 = arith.constant 0 : i32
    %c0_i32_1 = arith.constant 0 : i32
    return %c0_i32, %c0_i32_0 : i32, i32
  }
  func.func @transform_3(%arg0: i32) -> (i32, i32, i32) {
    %c0_i32 = arith.constant 0 : i32
    %c0_i32_0 = arith.constant 0 : i32
    %c0_i32_1 = arith.constant 0 : i32
    return %c0_i32, %c0_i32_0, %arg0 : i32, i32, i32
  }
}

module attributes {stable_mosaic.version = 11 : i64} {
  func.func @_dilated_inception_kernel(%arg0: i32, %arg1: memref<16x8x128xf32, #tpu.memory_space<vmem>>, %arg2: memref<16x56xf32, #tpu.memory_space<vmem>>, %arg3: memref<16x1xf32, #tpu.memory_space<vmem>>, %arg4: memref<4x16x128xf32, #tpu.memory_space<vmem>>) attributes {dimension_semantics = [#tpu.dimension_semantics<parallel>], iteration_bounds = array<i64: 1>, scalar_prefetch = 0 : i64, scratch_operands = 0 : i64, tpu.core_type = #tpu.core_type<tc>, window_params = [{transform_indices = @transform_0, window_bounds = array<i64: 16, 8, 128>}, {pipeline_mode = #tpu.pipeline_mode<synchronous>, transform_indices = @transform_1, window_bounds = array<i64: 16, 56>}, {pipeline_mode = #tpu.pipeline_mode<synchronous>, transform_indices = @transform_2, window_bounds = array<i64: 16, 1>}, {transform_indices = @transform_3, window_bounds = array<i64: 4, 16, 128>}]} {
    %c0 = arith.constant 0 : index
    %c0_0 = arith.constant 0 : index
    %0 = vector.load %arg2[%c0, %c0_0] : memref<16x56xf32, #tpu.memory_space<vmem>>, vector<16x56xf32>
    %c0_1 = arith.constant 0 : index
    %c0_2 = arith.constant 0 : index
    %1 = vector.load %arg3[%c0_1, %c0_2] : memref<16x1xf32, #tpu.memory_space<vmem>>, vector<16x1xf32>
    %c0_3 = arith.constant 0 : index
    %c0_4 = arith.constant 0 : index
    %c0_5 = arith.constant 0 : index
    %2 = vector.load %arg1[%c0_3, %c0_4, %c0_5] : memref<16x8x128xf32, #tpu.memory_space<vmem>>, vector<1x8x128xf32>
    %3 = vector.shape_cast %2 : vector<1x8x128xf32> to vector<8x128xf32>
    %c2 = arith.constant 2 : index
    %c0_6 = arith.constant 0 : index
    %c0_7 = arith.constant 0 : index
    %4 = vector.load %arg1[%c2, %c0_6, %c0_7] : memref<16x8x128xf32, #tpu.memory_space<vmem>>, vector<1x8x128xf32>
    %5 = vector.shape_cast %4 : vector<1x8x128xf32> to vector<8x128xf32>
    %c4 = arith.constant 4 : index
    %c0_8 = arith.constant 0 : index
    %c0_9 = arith.constant 0 : index
    %6 = vector.load %arg1[%c4, %c0_8, %c0_9] : memref<16x8x128xf32, #tpu.memory_space<vmem>>, vector<1x8x128xf32>
    %7 = vector.shape_cast %6 : vector<1x8x128xf32> to vector<8x128xf32>
    %c6 = arith.constant 6 : index
    %c0_10 = arith.constant 0 : index
    %c0_11 = arith.constant 0 : index
    %8 = vector.load %arg1[%c6, %c0_10, %c0_11] : memref<16x8x128xf32, #tpu.memory_space<vmem>>, vector<1x8x128xf32>
    %9 = vector.shape_cast %8 : vector<1x8x128xf32> to vector<8x128xf32>
    %c8 = arith.constant 8 : index
    %c0_12 = arith.constant 0 : index
    %c0_13 = arith.constant 0 : index
    %10 = vector.load %arg1[%c8, %c0_12, %c0_13] : memref<16x8x128xf32, #tpu.memory_space<vmem>>, vector<1x8x128xf32>
    %11 = vector.shape_cast %10 : vector<1x8x128xf32> to vector<8x128xf32>
    %c10 = arith.constant 10 : index
    %c0_14 = arith.constant 0 : index
    %c0_15 = arith.constant 0 : index
    %12 = vector.load %arg1[%c10, %c0_14, %c0_15] : memref<16x8x128xf32, #tpu.memory_space<vmem>>, vector<1x8x128xf32>
    %13 = vector.shape_cast %12 : vector<1x8x128xf32> to vector<8x128xf32>
    %c12 = arith.constant 12 : index
    %c0_16 = arith.constant 0 : index
    %c0_17 = arith.constant 0 : index
    %14 = vector.load %arg1[%c12, %c0_16, %c0_17] : memref<16x8x128xf32, #tpu.memory_space<vmem>>, vector<1x8x128xf32>
    %15 = vector.shape_cast %14 : vector<1x8x128xf32> to vector<8x128xf32>
    %16 = tpu.concatenate %3, %5, %7, %9, %11, %13, %15 in 0 : vector<8x128xf32>, vector<8x128xf32>, vector<8x128xf32>, vector<8x128xf32>, vector<8x128xf32>, vector<8x128xf32>, vector<8x128xf32> -> vector<56x128xf32>
    %cst = arith.constant dense<0.000000e+00> : vector<16x128xf32>
    %17 = tpu.matmul %0, %16, %cst {dimension_numbers = #tpu.dot_dimension_numbers<[1], [0], [0], [1], [0, 0, 1, 1], [], []>} : vector<16x56xf32>, vector<56x128xf32>, vector<16x128xf32> -> vector<16x128xf32>
    %18 = vector.broadcast %1 : vector<16x1xf32> to vector<16x128xf32>
    %19 = arith.addf %17, %18 : vector<16x128xf32>
    %c0_18 = arith.constant 0 : index
    %c0_19 = arith.constant 0 : index
    %c0_20 = arith.constant 0 : index
    %20 = vector.load %arg4[%c0_18, %c0_19, %c0_20] : memref<4x16x128xf32, #tpu.memory_space<vmem>>, vector<1x16x128xf32>
    %21 = vector.shape_cast %20 : vector<1x16x128xf32> to vector<16x128xf32>
    %22 = vector.shape_cast %19 : vector<16x128xf32> to vector<1x16x128xf32>
    tpu.vector_store %arg4[%c0_18, %c0_19, %c0_20], %22 {strides = array<i32>} : memref<4x16x128xf32, #tpu.memory_space<vmem>>, vector<1x16x128xf32>,
    %c1 = arith.constant 1 : index
    %c0_21 = arith.constant 0 : index
    %c0_22 = arith.constant 0 : index
    %23 = vector.load %arg1[%c1, %c0_21, %c0_22] : memref<16x8x128xf32, #tpu.memory_space<vmem>>, vector<1x8x128xf32>
    %24 = vector.shape_cast %23 : vector<1x8x128xf32> to vector<8x128xf32>
    %c3 = arith.constant 3 : index
    %c0_23 = arith.constant 0 : index
    %c0_24 = arith.constant 0 : index
    %25 = vector.load %arg1[%c3, %c0_23, %c0_24] : memref<16x8x128xf32, #tpu.memory_space<vmem>>, vector<1x8x128xf32>
    %26 = vector.shape_cast %25 : vector<1x8x128xf32> to vector<8x128xf32>
    %c5 = arith.constant 5 : index
    %c0_25 = arith.constant 0 : index
    %c0_26 = arith.constant 0 : index
    %27 = vector.load %arg1[%c5, %c0_25, %c0_26] : memref<16x8x128xf32, #tpu.memory_space<vmem>>, vector<1x8x128xf32>
    %28 = vector.shape_cast %27 : vector<1x8x128xf32> to vector<8x128xf32>
    %c7 = arith.constant 7 : index
    %c0_27 = arith.constant 0 : index
    %c0_28 = arith.constant 0 : index
    %29 = vector.load %arg1[%c7, %c0_27, %c0_28] : memref<16x8x128xf32, #tpu.memory_space<vmem>>, vector<1x8x128xf32>
    %30 = vector.shape_cast %29 : vector<1x8x128xf32> to vector<8x128xf32>
    %c9 = arith.constant 9 : index
    %c0_29 = arith.constant 0 : index
    %c0_30 = arith.constant 0 : index
    %31 = vector.load %arg1[%c9, %c0_29, %c0_30] : memref<16x8x128xf32, #tpu.memory_space<vmem>>, vector<1x8x128xf32>
    %32 = vector.shape_cast %31 : vector<1x8x128xf32> to vector<8x128xf32>
    %c11 = arith.constant 11 : index
    %c0_31 = arith.constant 0 : index
    %c0_32 = arith.constant 0 : index
    %33 = vector.load %arg1[%c11, %c0_31, %c0_32] : memref<16x8x128xf32, #tpu.memory_space<vmem>>, vector<1x8x128xf32>
    %34 = vector.shape_cast %33 : vector<1x8x128xf32> to vector<8x128xf32>
    %c13 = arith.constant 13 : index
    %c0_33 = arith.constant 0 : index
    %c0_34 = arith.constant 0 : index
    %35 = vector.load %arg1[%c13, %c0_33, %c0_34] : memref<16x8x128xf32, #tpu.memory_space<vmem>>, vector<1x8x128xf32>
    %36 = vector.shape_cast %35 : vector<1x8x128xf32> to vector<8x128xf32>
    %37 = tpu.concatenate %24, %26, %28, %30, %32, %34, %36 in 0 : vector<8x128xf32>, vector<8x128xf32>, vector<8x128xf32>, vector<8x128xf32>, vector<8x128xf32>, vector<8x128xf32>, vector<8x128xf32> -> vector<56x128xf32>
    %cst_35 = arith.constant dense<0.000000e+00> : vector<16x128xf32>
    %38 = tpu.matmul %0, %37, %cst_35 {dimension_numbers = #tpu.dot_dimension_numbers<[1], [0], [0], [1], [0, 0, 1, 1], [], []>} : vector<16x56xf32>, vector<56x128xf32>, vector<16x128xf32> -> vector<16x128xf32>
    %39 = vector.broadcast %1 : vector<16x1xf32> to vector<16x128xf32>
    %40 = arith.addf %38, %39 : vector<16x128xf32>
    %c1_36 = arith.constant 1 : index
    %c0_37 = arith.constant 0 : index
    %c0_38 = arith.constant 0 : index
    %41 = vector.load %arg4[%c1_36, %c0_37, %c0_38] : memref<4x16x128xf32, #tpu.memory_space<vmem>>, vector<1x16x128xf32>
    %42 = vector.shape_cast %41 : vector<1x16x128xf32> to vector<16x128xf32>
    %43 = vector.shape_cast %40 : vector<16x128xf32> to vector<1x16x128xf32>
    tpu.vector_store %arg4[%c1_36, %c0_37, %c0_38], %43 {strides = array<i32>} : memref<4x16x128xf32, #tpu.memory_space<vmem>>, vector<1x16x128xf32>,
    %c2_39 = arith.constant 2 : index
    %c0_40 = arith.constant 0 : index
    %c0_41 = arith.constant 0 : index
    %44 = vector.load %arg1[%c2_39, %c0_40, %c0_41] : memref<16x8x128xf32, #tpu.memory_space<vmem>>, vector<1x8x128xf32>
    %45 = vector.shape_cast %44 : vector<1x8x128xf32> to vector<8x128xf32>
    %c4_42 = arith.constant 4 : index
    %c0_43 = arith.constant 0 : index
    %c0_44 = arith.constant 0 : index
    %46 = vector.load %arg1[%c4_42, %c0_43, %c0_44] : memref<16x8x128xf32, #tpu.memory_space<vmem>>, vector<1x8x128xf32>
    %47 = vector.shape_cast %46 : vector<1x8x128xf32> to vector<8x128xf32>
    %c6_45 = arith.constant 6 : index
    %c0_46 = arith.constant 0 : index
    %c0_47 = arith.constant 0 : index
    %48 = vector.load %arg1[%c6_45, %c0_46, %c0_47] : memref<16x8x128xf32, #tpu.memory_space<vmem>>, vector<1x8x128xf32>
    %49 = vector.shape_cast %48 : vector<1x8x128xf32> to vector<8x128xf32>
    %c8_48 = arith.constant 8 : index
    %c0_49 = arith.constant 0 : index
    %c0_50 = arith.constant 0 : index
    %50 = vector.load %arg1[%c8_48, %c0_49, %c0_50] : memref<16x8x128xf32, #tpu.memory_space<vmem>>, vector<1x8x128xf32>
    %51 = vector.shape_cast %50 : vector<1x8x128xf32> to vector<8x128xf32>
    %c10_51 = arith.constant 10 : index
    %c0_52 = arith.constant 0 : index
    %c0_53 = arith.constant 0 : index
    %52 = vector.load %arg1[%c10_51, %c0_52, %c0_53] : memref<16x8x128xf32, #tpu.memory_space<vmem>>, vector<1x8x128xf32>
    %53 = vector.shape_cast %52 : vector<1x8x128xf32> to vector<8x128xf32>
    %c12_54 = arith.constant 12 : index
    %c0_55 = arith.constant 0 : index
    %c0_56 = arith.constant 0 : index
    %54 = vector.load %arg1[%c12_54, %c0_55, %c0_56] : memref<16x8x128xf32, #tpu.memory_space<vmem>>, vector<1x8x128xf32>
    %55 = vector.shape_cast %54 : vector<1x8x128xf32> to vector<8x128xf32>
    %c14 = arith.constant 14 : index
    %c0_57 = arith.constant 0 : index
    %c0_58 = arith.constant 0 : index
    %56 = vector.load %arg1[%c14, %c0_57, %c0_58] : memref<16x8x128xf32, #tpu.memory_space<vmem>>, vector<1x8x128xf32>
    %57 = vector.shape_cast %56 : vector<1x8x128xf32> to vector<8x128xf32>
    %58 = tpu.concatenate %45, %47, %49, %51, %53, %55, %57 in 0 : vector<8x128xf32>, vector<8x128xf32>, vector<8x128xf32>, vector<8x128xf32>, vector<8x128xf32>, vector<8x128xf32>, vector<8x128xf32> -> vector<56x128xf32>
    %cst_59 = arith.constant dense<0.000000e+00> : vector<16x128xf32>
    %59 = tpu.matmul %0, %58, %cst_59 {dimension_numbers = #tpu.dot_dimension_numbers<[1], [0], [0], [1], [0, 0, 1, 1], [], []>} : vector<16x56xf32>, vector<56x128xf32>, vector<16x128xf32> -> vector<16x128xf32>
    %60 = vector.broadcast %1 : vector<16x1xf32> to vector<16x128xf32>
    %61 = arith.addf %59, %60 : vector<16x128xf32>
    %c2_60 = arith.constant 2 : index
    %c0_61 = arith.constant 0 : index
    %c0_62 = arith.constant 0 : index
    %62 = vector.load %arg4[%c2_60, %c0_61, %c0_62] : memref<4x16x128xf32, #tpu.memory_space<vmem>>, vector<1x16x128xf32>
    %63 = vector.shape_cast %62 : vector<1x16x128xf32> to vector<16x128xf32>
    %64 = vector.shape_cast %61 : vector<16x128xf32> to vector<1x16x128xf32>
    tpu.vector_store %arg4[%c2_60, %c0_61, %c0_62], %64 {strides = array<i32>} : memref<4x16x128xf32, #tpu.memory_space<vmem>>, vector<1x16x128xf32>,
    %c3_63 = arith.constant 3 : index
    %c0_64 = arith.constant 0 : index
    %c0_65 = arith.constant 0 : index
    %65 = vector.load %arg1[%c3_63, %c0_64, %c0_65] : memref<16x8x128xf32, #tpu.memory_space<vmem>>, vector<1x8x128xf32>
    %66 = vector.shape_cast %65 : vector<1x8x128xf32> to vector<8x128xf32>
    %c5_66 = arith.constant 5 : index
    %c0_67 = arith.constant 0 : index
    %c0_68 = arith.constant 0 : index
    %67 = vector.load %arg1[%c5_66, %c0_67, %c0_68] : memref<16x8x128xf32, #tpu.memory_space<vmem>>, vector<1x8x128xf32>
    %68 = vector.shape_cast %67 : vector<1x8x128xf32> to vector<8x128xf32>
    %c7_69 = arith.constant 7 : index
    %c0_70 = arith.constant 0 : index
    %c0_71 = arith.constant 0 : index
    %69 = vector.load %arg1[%c7_69, %c0_70, %c0_71] : memref<16x8x128xf32, #tpu.memory_space<vmem>>, vector<1x8x128xf32>
    %70 = vector.shape_cast %69 : vector<1x8x128xf32> to vector<8x128xf32>
    %c9_72 = arith.constant 9 : index
    %c0_73 = arith.constant 0 : index
    %c0_74 = arith.constant 0 : index
    %71 = vector.load %arg1[%c9_72, %c0_73, %c0_74] : memref<16x8x128xf32, #tpu.memory_space<vmem>>, vector<1x8x128xf32>
    %72 = vector.shape_cast %71 : vector<1x8x128xf32> to vector<8x128xf32>
    %c11_75 = arith.constant 11 : index
    %c0_76 = arith.constant 0 : index
    %c0_77 = arith.constant 0 : index
    %73 = vector.load %arg1[%c11_75, %c0_76, %c0_77] : memref<16x8x128xf32, #tpu.memory_space<vmem>>, vector<1x8x128xf32>
    %74 = vector.shape_cast %73 : vector<1x8x128xf32> to vector<8x128xf32>
    %c13_78 = arith.constant 13 : index
    %c0_79 = arith.constant 0 : index
    %c0_80 = arith.constant 0 : index
    %75 = vector.load %arg1[%c13_78, %c0_79, %c0_80] : memref<16x8x128xf32, #tpu.memory_space<vmem>>, vector<1x8x128xf32>
    %76 = vector.shape_cast %75 : vector<1x8x128xf32> to vector<8x128xf32>
    %c15 = arith.constant 15 : index
    %c0_81 = arith.constant 0 : index
    %c0_82 = arith.constant 0 : index
    %77 = vector.load %arg1[%c15, %c0_81, %c0_82] : memref<16x8x128xf32, #tpu.memory_space<vmem>>, vector<1x8x128xf32>
    %78 = vector.shape_cast %77 : vector<1x8x128xf32> to vector<8x128xf32>
    %79 = tpu.concatenate %66, %68, %70, %72, %74, %76, %78 in 0 : vector<8x128xf32>, vector<8x128xf32>, vector<8x128xf32>, vector<8x128xf32>, vector<8x128xf32>, vector<8x128xf32>, vector<8x128xf32> -> vector<56x128xf32>
    %cst_83 = arith.constant dense<0.000000e+00> : vector<16x128xf32>
    %80 = tpu.matmul %0, %79, %cst_83 {dimension_numbers = #tpu.dot_dimension_numbers<[1], [0], [0], [1], [0, 0, 1, 1], [], []>} : vector<16x56xf32>, vector<56x128xf32>, vector<16x128xf32> -> vector<16x128xf32>
    %81 = vector.broadcast %1 : vector<16x1xf32> to vector<16x128xf32>
    %82 = arith.addf %80, %81 : vector<16x128xf32>
    %c3_84 = arith.constant 3 : index
    %c0_85 = arith.constant 0 : index
    %c0_86 = arith.constant 0 : index
    %83 = vector.load %arg4[%c3_84, %c0_85, %c0_86] : memref<4x16x128xf32, #tpu.memory_space<vmem>>, vector<1x16x128xf32>
    %84 = vector.shape_cast %83 : vector<1x16x128xf32> to vector<16x128xf32>
    %85 = vector.shape_cast %82 : vector<16x128xf32> to vector<1x16x128xf32>
    tpu.vector_store %arg4[%c3_84, %c0_85, %c0_86], %85 {strides = array<i32>} : memref<4x16x128xf32, #tpu.memory_space<vmem>>, vector<1x16x128xf32>,
    return
  }
  func.func @transform_0(%arg0: i32) -> (i32, i32, i32) {
    %c0_i32 = arith.constant 0 : i32
    %c0_i32_0 = arith.constant 0 : i32
    %c0_i32_1 = arith.constant 0 : i32
    return %c0_i32, %c0_i32_0, %arg0 : i32, i32, i32
  }
  func.func @transform_1(%arg0: i32) -> (i32, i32) {
    %c0_i32 = arith.constant 0 : i32
    %c0_i32_0 = arith.constant 0 : i32
    %c0_i32_1 = arith.constant 0 : i32
    return %c0_i32, %c0_i32_0 : i32, i32
  }
  func.func @transform_2(%arg0: i32) -> (i32, i32) {
    %c0_i32 = arith.constant 0 : i32
    %c0_i32_0 = arith.constant 0 : i32
    %c0_i32_1 = arith.constant 0 : i32
    return %c0_i32, %c0_i32_0 : i32, i32
  }
  func.func @transform_3(%arg0: i32) -> (i32, i32, i32) {
    %c0_i32 = arith.constant 0 : i32
    %c0_i32_0 = arith.constant 0 : i32
    %c0_i32_1 = arith.constant 0 : i32
    return %c0_i32, %c0_i32_0, %arg0 : i32, i32, i32
  }
}

</mosaic_0001>

<bundles_post_ra>
// kernel: tpu_custom_call.1
= control target key start
LH: loop header
LB: loop body
LE: loop exit
PB: predicated region body
PF: predicated region fallthrough
CT: control target
= control target key end

     0   :  { %8 = vsyncpa [#allocation3], 0  ;;  %s710_s0 = inlined_call_operand.hbm [shape: f32[16,8,128], index: 0, kind: input, shape index: {}]   ;;  %s711_s1 = inlined_call_operand.vmem [shape: f32[16,56], index: 1, kind: input, shape index: {}]   ;;  %s712_s2 = inlined_call_operand.vmem [shape: f32[16,1], index: 2, kind: input, shape index: {}]   ;;  %s713_s3 = inlined_call_operand.hbm [shape: f32[4,16,128], index: 3, kind: output, shape index: {}]  }
   0x1   :  { %9 = vsyncpa [#allocation4], 0  ;;  %s635_s12 = smov [#allocation2]   ;;  %s587_s16 = scalar_lea.hbm %s710_s0, 2048 }
   0x2   :  { %s15_s13 = sshll.u32 %s635_s12, 4  ;;  %p588_p0 = scmp.ne.s32.totalorder %s710_s0, %s587_s16  ;;  %s16_s13 = int_to_ptr.vmem [resolvable:$true] %s15_s13 }
   0x3   :  { %p591_p1 = scmp.lt.u32.totalorder %s587_s16, %s710_s0 }
   0x5   :  { %p593_p2 = pnand %p591_p1, %p588_p0 }
   0x7   :  { %596 = shalt.err (!%p593_p2)
}
   0x8   :  { %s597_s21 = scalar_lea.vmem %s16_s13, 2048  ;;  %p602_p4 = scmp.lt.s32.totalorder %s16_s13, %s16_s13 }
   0x9   :  { %p598_p3 = scmp.ne.s32.totalorder %s16_s13, %s597_s21  ;;  %p603_p5 = scmp.lt.s32.totalorder %s597_s21, %s597_s21 }
   0xb   :  { %p604_p6 = por %p603_p5, %p602_p4 }
   0xd   :  { %p605_p7 = pnand %p604_p6, %p598_p3 }
   0xf   :  { %608 = shalt.err (!%p605_p7)
}
  0x10   :  { %s636_s22 = smov 128   ;;  %s637_s23 = smov 8  }
  0x11   :  { %21 = dma.hbm_to_vmem [thread:$0]  %s710_s0, 2048, %s16_s13, [#allocation3], %s636_s22, %s636_s22, %s637_s23  }
  0x12   :  { %631 = dma.done.wait [#allocation3], 2048  }
  0x13   :  { %632 = vsyncadd [#allocation3], 4294965248  ;;  %v638_v0 = vmov 0   ;;  %v33_v1 = vld [vmem:[#allocation2] sm:$0xff]  ;;  %v35_v2 = vld [vmem:[#allocation2 + $0x10] sm:$0xff]  ;;  %vm56_vm0 = vcmask 457728  }
  0x14   :  { %586 = vset.pattern.permute.xlu0 %v638_v0  ;;  %v141_v3 = vld [vmem:[#allocation2 + $0x8] sm:$0xff]  ;;  %v533_v4 = vpack.c.bf16 %v35_v2, %v33_v1  ;;  %v143_v5 = vld [vmem:[#allocation2 + $0x18] sm:$0xff]  ;;  %v37_v6 = vld [vmem:[#allocation2 + $0x20] sm:$0xff] }
  0x15   :  { %v39_v7 = vld [vmem:[#allocation2 + $0x30] sm:$0xff]  ;;  %v545_v8 = vpack.c.bf16 %v143_v5, %v141_v3  ;;  %v145_v10 = vld [vmem:[#allocation2 + $0x28] sm:$0xff]  ;;  %v147_v11 = vld [vmem:[#allocation2 + $0x38] sm:$0xff]  ;;  %v557_v25 = vpack.c.bf16 %v37_v6, %v35_v2 }
  0x16   :  { %v537_v9 = vpack.c.bf16 %v39_v7, %v37_v6  ;;  %v41_v12 = vld [vmem:[#allocation2 + $0x40] sm:$0xff]  ;;  %534 = vmatprep.subr.bf16.mxu0 %v533_v4  ;;  %v549_v13 = vpack.c.bf16 %v147_v11, %v145_v10  ;;  %v43_v14 = vld [vmem:[#allocation2 + $0x50] sm:$0xff]  ;;  %v149_v15 = vld [vmem:[#allocation2 + $0x48] sm:$0xff]  ;;  %v569_v26 = vpack.c.bf16 %v145_v10, %v143_v5 }
  0x17   :  { %v151_v16 = vld [vmem:[#allocation2 + $0x58] sm:$0xff]  ;;  %546 = vmatprep.subr.bf16.mxu1 %v545_v8  ;;  %536 = vmatpush3.bf16.msra.mxu0 %v533_v4  ;;  %v29_v17 = vld [vmem:[%s711_s1] sm:$0xff]  ;;  %v541_v18 = vpack.c.bf16 %v43_v14, %v41_v12  ;;  %v32_v21 = vld [vmem:[%s712_s2 + $0x8] sm:$0xff]  ;;  %v561_v27 = vpack.c.bf16 %v41_v12, %v39_v7  ;;  %v573_v28 = vpack.c.bf16 %v149_v15, %v147_v11 }
  0x18   :  { %548 = vmatpush3.bf16.msra.mxu1 %v545_v8  ;;  %538 = vmatprep.subr.bf16.mxu0 %v537_v9  ;;  %v553_v19 = vpack.c.bf16 %v151_v16, %v149_v15  ;;  %v31_v20 = vld [vmem:[%s712_s2] sm:$0xff]  ;;  %v153_v23 = vld [vmem:[#allocation2 + $0x68] sm:$0xff]  ;;  %v239_v31 = vld [vmem:[#allocation2 + $0x70] sm:$0xff] }
  0x19   :  { %550 = vmatprep.subr.bf16.mxu1 %v549_v13  ;;  %479 = vmatprep.mubr.msk.f32.mxu0 %vm56_vm0, %v29_v17  ;;  %v45_v22 = vld [vmem:[#allocation2 + $0x60] sm:$0xff]  ;;  %v30_v24 = vld [vmem:[%s711_s1 + $0x8] sm:$0xff]  ;;  %v577_v30 = vpack.c.bf16 %v153_v23, %v151_v16  ;;  %v325_v32 = vld [vmem:[#allocation2 + $0x78] sm:$0xff]  ;;  %s639_s1 = smov [#allocation5]  }
  0x1a   :  { %496 = vmatprep.mubr.msk.f32.mxu1 %vm56_vm0, %v29_v17  ;;  %48 = vperm.xlu0 %586, %v31_v20   ;;  %v565_v29 = vpack.c.bf16 %v45_v22, %v43_v14  ;;  %s409_s2 = sshll.u32 %s639_s1, 4  ;;  %s410_s2 = int_to_ptr.vmem [resolvable:$true] %s409_s2 }
  0x1b   :  { %540 = vmatpush3.bf16.msra.mxu0 %v537_v9  ;;  %s609_s6 = scalar_lea.vmem %s410_s2, 1024  ;;  %p614_p9 = scmp.lt.s32.totalorder %s410_s2, %s410_s2 }
  0x1c   :  { %552 = vmatpush3.bf16.msra.mxu1 %v549_v13  ;;  %542 = vmatprep.subr.bf16.mxu0 %v541_v18  ;;  %p610_p8 = scmp.ne.s32.totalorder %s410_s2, %s609_s6  ;;  %p615_p10 = scmp.lt.s32.totalorder %s609_s6, %s609_s6 }
  0x1d   :  { %554 = vmatprep.subr.bf16.mxu1 %v553_v19 }
  0x1e   :  { %53 = vperm.xlu0 %586, %v32_v21   ;;  %p616_p11 = por %p615_p10, %p614_p9 }
  0x1f   :  { %544 = vmatpush3.bf16.msra.mxu0 %v541_v18 }
  0x20   :  { %556 = vmatpush3.bf16.msra.mxu1 %v553_v19  ;;  %477 = vmatprep.subr.mxu0 %v45_v22  ;;  %p617_p12 = pnand %p616_p11, %p610_p8 }
  0x21   :  { %494 = vmatprep.subr.mxu1 %v153_v23 }
  0x23   :  { %478 = vmatpush3.msra.mxu0 %v45_v22 }
  0x24   :  { %495 = vmatpush3.msra.mxu1 %v153_v23  ;;  %480 = vmatmul.mubr.msk.f32.vlgmr.msra.gmra.mrb[0].mxu0 %vm56_vm0, %v30_v24 }
  0x25   :  { %497 = vmatmul.mubr.msk.f32.vlgmr.msra.gmra.mrb[0].mxu1 %vm56_vm0, %v30_v24  ;;  %558 = vmatprep.subr.bf16.mxu0 %v557_v25 }
  0x26   :  { %570 = vmatprep.subr.bf16.mxu1 %v569_v26  ;;  %560 = vmatpush3.bf16.msra.mxu0 %v557_v25 }
  0x27   :  { %572 = vmatpush3.bf16.msra.mxu1 %v569_v26  ;;  %562 = vmatprep.subr.bf16.mxu0 %v561_v27 }
  0x28   :  { %574 = vmatprep.subr.bf16.mxu1 %v573_v28  ;;  %513 = vmatprep.mubr.msk.f32.mxu0 %vm56_vm0, %v29_v17 }
  0x29   :  { %530 = vmatprep.mubr.msk.f32.mxu1 %vm56_vm0, %v29_v17 }
  0x2a   :  { %564 = vmatpush3.bf16.msra.mxu0 %v561_v27 }
  0x2b   :  { %576 = vmatpush3.bf16.msra.mxu1 %v573_v28  ;;  %566 = vmatprep.subr.bf16.mxu0 %v565_v29 }
  0x2c   :  { %578 = vmatprep.subr.bf16.mxu1 %v577_v30 }
  0x2e   :  { %568 = vmatpush3.bf16.msra.mxu0 %v565_v29 }
  0x2f   :  { %580 = vmatpush3.bf16.msra.mxu1 %v577_v30  ;;  %511 = vmatprep.subr.mxu0 %v239_v31 }
  0x30   :  { %528 = vmatprep.subr.mxu1 %v325_v32 }
  0x32   :  { %512 = vmatpush3.msra.mxu0 %v239_v31 }
  0x33   :  { %529 = vmatpush3.msra.mxu1 %v325_v32  ;;  %514 = vmatmul.mubr.msk.f32.vlgmr.msra.gmra.mrb[2].mxu0 %vm56_vm0, %v30_v24 }
  0x34   :  { %531 = vmatmul.mubr.msk.f32.vlgmr.msra.gmra.mrb[2].mxu1 %vm56_vm0, %v30_v24 }
  0x99   :  { %v49_v33 = vpop.permute.xlu0 %48 }
  0x9d   :  { %v54_v34 = vpop.permute.xlu0 %53 }
  0xf7   :  { %v481_v35 = vpop.f32.mrb[0].mxu0 }
  0xf8   :  { %v498_v36 = vpop.f32.mrb[0].mxu1  ;;  %v135_v37 = vadd.f32 %v481_v35, %v54_v34  ;;  %v129_v38 = vpop.f32.mrb[1].mxu0 }
  0xf9   :  { %v226_v39 = vadd.f32 %v498_v36, %v54_v34  ;;  %v130_v40 = vadd.f32 %v129_v38, %v49_v33  ;;  %v220_v41 = vpop.f32.mrb[1].mxu1 }
  0xfa   :  { %139 = vst [vmem:[#allocation5 + $0x8] sm:$0xff] %v135_v37  ;;  %v221_v42 = vadd.f32 %v220_v41, %v49_v33 }
  0xfb   :  { %231 = vst [vmem:[#allocation5 + $0x18] sm:$0xff] %v226_v39  ;;  %138 = vst [vmem:[#allocation5] sm:$0xff] %v130_v40 }
  0xfc   :  { %230 = vst [vmem:[#allocation5 + $0x10] sm:$0xff] %v221_v42 }
 0x106   :  { %v515_v43 = vpop.f32.mrb[2].mxu0 }
 0x107   :  { %v312_v44 = vadd.f32 %v515_v43, %v54_v34  ;;  %v532_v45 = vpop.f32.mrb[2].mxu1  ;;  %v306_v46 = vpop.f32.mrb[3].mxu0 }
 0x108   :  { %v398_v47 = vadd.f32 %v532_v45, %v54_v34  ;;  %v307_v48 = vadd.f32 %v306_v46, %v49_v33  ;;  %v392_v49 = vpop.f32.mrb[3].mxu1 }
 0x109   :  { %317 = vst [vmem:[#allocation5 + $0x28] sm:$0xff] %v312_v44  ;;  %v393_v50 = vadd.f32 %v392_v49, %v49_v33 }
 0x10a   :  { %403 = vst [vmem:[#allocation5 + $0x38] sm:$0xff] %v398_v47  ;;  %316 = vst [vmem:[#allocation5 + $0x20] sm:$0xff] %v307_v48 }
 0x10b   :  { %402 = vst [vmem:[#allocation5 + $0x30] sm:$0xff] %v393_v50 }
 0x10c   :  { %620 = shalt.err (!%p617_p12)
}
 0x10d   :  { %s621_s9 = scalar_lea.hbm %s713_s3, 1024 }
 0x10e   :  { %p622_p13 = scmp.ne.s32.totalorder %s713_s3, %s621_s9  ;;  %p625_p0 = scmp.lt.u32.totalorder %s621_s9, %s713_s3 }
 0x110   :  { %p627_p1 = pnand %p625_p0, %p622_p13 }
 0x112   :  { %630 = shalt.err (!%p627_p1)
}
 0x113   :  { %415 = dma.vmem_to_hbm [thread:$0]  %s410_s2, 1024, %s713_s3, [#allocation4], %s636_s22, %s636_s22, %s637_s23  }
 0x114   :  { %633 = dma.done.wait [#allocation4], 1024  }
 0x115   :  { %634 = vsyncadd [#allocation4], 4294966272 }
 0x116   :  { %419 = vsyncpa [#allocation3], 1 }
 0x117   :  { %420 = vsyncpa [#allocation4], 1 }

// kernel: tpu_custom_call.1
= control target key start
LH: loop header
LB: loop body
LE: loop exit
PB: predicated region body
PF: predicated region fallthrough
CT: control target
= control target key end

     0   :  { %8 = vsyncpa [#allocation3], 0  ;;  %s710_s0 = inlined_call_operand.hbm [shape: f32[16,8,128], index: 0, kind: input, shape index: {}]   ;;  %s711_s1 = inlined_call_operand.vmem [shape: f32[16,56], index: 1, kind: input, shape index: {}]   ;;  %s712_s2 = inlined_call_operand.vmem [shape: f32[16,1], index: 2, kind: input, shape index: {}]   ;;  %s713_s3 = inlined_call_operand.hbm [shape: f32[4,16,128], index: 3, kind: output, shape index: {}]  }
   0x1   :  { %9 = vsyncpa [#allocation4], 0  ;;  %s635_s12 = smov [#allocation2]   ;;  %s587_s16 = scalar_lea.hbm %s710_s0, 2048 }
   0x2   :  { %s15_s13 = sshll.u32 %s635_s12, 4  ;;  %p588_p0 = scmp.ne.s32.totalorder %s710_s0, %s587_s16  ;;  %s16_s13 = int_to_ptr.vmem [resolvable:$true] %s15_s13 }
   0x3   :  { %p591_p1 = scmp.lt.u32.totalorder %s587_s16, %s710_s0 }
   0x5   :  { %p593_p2 = pnand %p591_p1, %p588_p0 }
   0x7   :  { %596 = shalt.err (!%p593_p2)
}
   0x8   :  { %s597_s21 = scalar_lea.vmem %s16_s13, 2048  ;;  %p602_p4 = scmp.lt.s32.totalorder %s16_s13, %s16_s13 }
   0x9   :  { %p598_p3 = scmp.ne.s32.totalorder %s16_s13, %s597_s21  ;;  %p603_p5 = scmp.lt.s32.totalorder %s597_s21, %s597_s21 }
   0xb   :  { %p604_p6 = por %p603_p5, %p602_p4 }
   0xd   :  { %p605_p7 = pnand %p604_p6, %p598_p3 }
   0xf   :  { %608 = shalt.err (!%p605_p7)
}
  0x10   :  { %s636_s22 = smov 128   ;;  %s637_s23 = smov 8  }
  0x11   :  { %21 = dma.hbm_to_vmem [thread:$0]  %s710_s0, 2048, %s16_s13, [#allocation3], %s636_s22, %s636_s22, %s637_s23  }
  0x12   :  { %631 = dma.done.wait [#allocation3], 2048  }
  0x13   :  { %632 = vsyncadd [#allocation3], 4294965248  ;;  %v638_v0 = vmov 0   ;;  %v33_v1 = vld [vmem:[#allocation2] sm:$0xff]  ;;  %v35_v2 = vld [vmem:[#allocation2 + $0x10] sm:$0xff]  ;;  %vm56_vm0 = vcmask 457728  }
  0x14   :  { %586 = vset.pattern.permute.xlu0 %v638_v0  ;;  %v141_v3 = vld [vmem:[#allocation2 + $0x8] sm:$0xff]  ;;  %v533_v4 = vpack.c.bf16 %v35_v2, %v33_v1  ;;  %v143_v5 = vld [vmem:[#allocation2 + $0x18] sm:$0xff]  ;;  %v37_v6 = vld [vmem:[#allocation2 + $0x20] sm:$0xff] }
  0x15   :  { %v39_v7 = vld [vmem:[#allocation2 + $0x30] sm:$0xff]  ;;  %v545_v8 = vpack.c.bf16 %v143_v5, %v141_v3  ;;  %v145_v10 = vld [vmem:[#allocation2 + $0x28] sm:$0xff]  ;;  %v147_v11 = vld [vmem:[#allocation2 + $0x38] sm:$0xff]  ;;  %v557_v25 = vpack.c.bf16 %v37_v6, %v35_v2 }
  0x16   :  { %v537_v9 = vpack.c.bf16 %v39_v7, %v37_v6  ;;  %v41_v12 = vld [vmem:[#allocation2 + $0x40] sm:$0xff]  ;;  %534 = vmatprep.subr.bf16.mxu0 %v533_v4  ;;  %v549_v13 = vpack.c.bf16 %v147_v11, %v145_v10  ;;  %v43_v14 = vld [vmem:[#allocation2 + $0x50] sm:$0xff]  ;;  %v149_v15 = vld [vmem:[#allocation2 + $0x48] sm:$0xff]  ;;  %v569_v26 = vpack.c.bf16 %v145_v10, %v143_v5 }
  0x17   :  { %v151_v16 = vld [vmem:[#allocation2 + $0x58] sm:$0xff]  ;;  %546 = vmatprep.subr.bf16.mxu1 %v545_v8  ;;  %536 = vmatpush3.bf16.msra.mxu0 %v533_v4  ;;  %v29_v17 = vld [vmem:[%s711_s1] sm:$0xff]  ;;  %v541_v18 = vpack.c.bf16 %v43_v14, %v41_v12  ;;  %v32_v21 = vld [vmem:[%s712_s2 + $0x8] sm:$0xff]  ;;  %v561_v27 = vpack.c.bf16 %v41_v12, %v39_v7  ;;  %v573_v28 = vpack.c.bf16 %v149_v15, %v147_v11 }
  0x18   :  { %548 = vmatpush3.bf16.msra.mxu1 %v545_v8  ;;  %538 = vmatprep.subr.bf16.mxu0 %v537_v9  ;;  %v553_v19 = vpack.c.bf16 %v151_v16, %v149_v15  ;;  %v31_v20 = vld [vmem:[%s712_s2] sm:$0xff]  ;;  %v153_v23 = vld [vmem:[#allocation2 + $0x68] sm:$0xff]  ;;  %v239_v31 = vld [vmem:[#allocation2 + $0x70] sm:$0xff] }
  0x19   :  { %550 = vmatprep.subr.bf16.mxu1 %v549_v13  ;;  %479 = vmatprep.mubr.msk.f32.mxu0 %vm56_vm0, %v29_v17  ;;  %v45_v22 = vld [vmem:[#allocation2 + $0x60] sm:$0xff]  ;;  %v30_v24 = vld [vmem:[%s711_s1 + $0x8] sm:$0xff]  ;;  %v577_v30 = vpack.c.bf16 %v153_v23, %v151_v16  ;;  %v325_v32 = vld [vmem:[#allocation2 + $0x78] sm:$0xff]  ;;  %s639_s1 = smov [#allocation5]  }
  0x1a   :  { %496 = vmatprep.mubr.msk.f32.mxu1 %vm56_vm0, %v29_v17  ;;  %48 = vperm.xlu0 %586, %v31_v20   ;;  %v565_v29 = vpack.c.bf16 %v45_v22, %v43_v14  ;;  %s409_s2 = sshll.u32 %s639_s1, 4  ;;  %s410_s2 = int_to_ptr.vmem [resolvable:$true] %s409_s2 }
  0x1b   :  { %540 = vmatpush3.bf16.msra.mxu0 %v537_v9  ;;  %s609_s6 = scalar_lea.vmem %s410_s2, 1024  ;;  %p614_p9 = scmp.lt.s32.totalorder %s410_s2, %s410_s2 }
  0x1c   :  { %552 = vmatpush3.bf16.msra.mxu1 %v549_v13  ;;  %542 = vmatprep.subr.bf16.mxu0 %v541_v18  ;;  %p610_p8 = scmp.ne.s32.totalorder %s410_s2, %s609_s6  ;;  %p615_p10 = scmp.lt.s32.totalorder %s609_s6, %s609_s6 }
  0x1d   :  { %554 = vmatprep.subr.bf16.mxu1 %v553_v19 }
  0x1e   :  { %53 = vperm.xlu0 %586, %v32_v21   ;;  %p616_p11 = por %p615_p10, %p614_p9 }
  0x1f   :  { %544 = vmatpush3.bf16.msra.mxu0 %v541_v18 }
  0x20   :  { %556 = vmatpush3.bf16.msra.mxu1 %v553_v19  ;;  %477 = vmatprep.subr.mxu0 %v45_v22  ;;  %p617_p12 = pnand %p616_p11, %p610_p8 }
  0x21   :  { %494 = vmatprep.subr.mxu1 %v153_v23 }
  0x23   :  { %478 = vmatpush3.msra.mxu0 %v45_v22 }
  0x24   :  { %495 = vmatpush3.msra.mxu1 %v153_v23  ;;  %480 = vmatmul.mubr.msk.f32.vlgmr.msra.gmra.mrb[0].mxu0 %vm56_vm0, %v30_v24 }
  0x25   :  { %497 = vmatmul.mubr.msk.f32.vlgmr.msra.gmra.mrb[0].mxu1 %vm56_vm0, %v30_v24  ;;  %558 = vmatprep.subr.bf16.mxu0 %v557_v25 }
  0x26   :  { %570 = vmatprep.subr.bf16.mxu1 %v569_v26  ;;  %560 = vmatpush3.bf16.msra.mxu0 %v557_v25 }
  0x27   :  { %572 = vmatpush3.bf16.msra.mxu1 %v569_v26  ;;  %562 = vmatprep.subr.bf16.mxu0 %v561_v27 }
  0x28   :  { %574 = vmatprep.subr.bf16.mxu1 %v573_v28  ;;  %513 = vmatprep.mubr.msk.f32.mxu0 %vm56_vm0, %v29_v17 }
  0x29   :  { %530 = vmatprep.mubr.msk.f32.mxu1 %vm56_vm0, %v29_v17 }
  0x2a   :  { %564 = vmatpush3.bf16.msra.mxu0 %v561_v27 }
  0x2b   :  { %576 = vmatpush3.bf16.msra.mxu1 %v573_v28  ;;  %566 = vmatprep.subr.bf16.mxu0 %v565_v29 }
  0x2c   :  { %578 = vmatprep.subr.bf16.mxu1 %v577_v30 }
  0x2e   :  { %568 = vmatpush3.bf16.msra.mxu0 %v565_v29 }
  0x2f   :  { %580 = vmatpush3.bf16.msra.mxu1 %v577_v30  ;;  %511 = vmatprep.subr.mxu0 %v239_v31 }
  0x30   :  { %528 = vmatprep.subr.mxu1 %v325_v32 }
  0x32   :  { %512 = vmatpush3.msra.mxu0 %v239_v31 }
  0x33   :  { %529 = vmatpush3.msra.mxu1 %v325_v32  ;;  %514 = vmatmul.mubr.msk.f32.vlgmr.msra.gmra.mrb[2].mxu0 %vm56_vm0, %v30_v24 }
  0x34   :  { %531 = vmatmul.mubr.msk.f32.vlgmr.msra.gmra.mrb[2].mxu1 %vm56_vm0, %v30_v24 }
  0x99   :  { %v49_v33 = vpop.permute.xlu0 %48 }
  0x9d   :  { %v54_v34 = vpop.permute.xlu0 %53 }
  0xf7   :  { %v481_v35 = vpop.f32.mrb[0].mxu0 }
  0xf8   :  { %v498_v36 = vpop.f32.mrb[0].mxu1  ;;  %v135_v37 = vadd.f32 %v481_v35, %v54_v34  ;;  %v129_v38 = vpop.f32.mrb[1].mxu0 }
  0xf9   :  { %v226_v39 = vadd.f32 %v498_v36, %v54_v34  ;;  %v130_v40 = vadd.f32 %v129_v38, %v49_v33  ;;  %v220_v41 = vpop.f32.mrb[1].mxu1 }
  0xfa   :  { %139 = vst [vmem:[#allocation5 + $0x8] sm:$0xff] %v135_v37  ;;  %v221_v42 = vadd.f32 %v220_v41, %v49_v33 }
  0xfb   :  { %231 = vst [vmem:[#allocation5 + $0x18] sm:$0xff] %v226_v39  ;;  %138 = vst [vmem:[#allocation5] sm:$0xff] %v130_v40 }
  0xfc   :  { %230 = vst [vmem:[#allocation5 + $0x10] sm:$0xff] %v221_v42 }
 0x106   :  { %v515_v43 = vpop.f32.mrb[2].mxu0 }
 0x107   :  { %v312_v44 = vadd.f32 %v515_v43, %v54_v34  ;;  %v532_v45 = vpop.f32.mrb[2].mxu1  ;;  %v306_v46 = vpop.f32.mrb[3].mxu0 }
 0x108   :  { %v398_v47 = vadd.f32 %v532_v45, %v54_v34  ;;  %v307_v48 = vadd.f32 %v306_v46, %v49_v33  ;;  %v392_v49 = vpop.f32.mrb[3].mxu1 }
 0x109   :  { %317 = vst [vmem:[#allocation5 + $0x28] sm:$0xff] %v312_v44  ;;  %v393_v50 = vadd.f32 %v392_v49, %v49_v33 }
 0x10a   :  { %403 = vst [vmem:[#allocation5 + $0x38] sm:$0xff] %v398_v47  ;;  %316 = vst [vmem:[#allocation5 + $0x20] sm:$0xff] %v307_v48 }
 0x10b   :  { %402 = vst [vmem:[#allocation5 + $0x30] sm:$0xff] %v393_v50 }
 0x10c   :  { %620 = shalt.err (!%p617_p12)
}
 0x10d   :  { %s621_s9 = scalar_lea.hbm %s713_s3, 1024 }
 0x10e   :  { %p622_p13 = scmp.ne.s32.totalorder %s713_s3, %s621_s9  ;;  %p625_p0 = scmp.lt.u32.totalorder %s621_s9, %s713_s3 }
 0x110   :  { %p627_p1 = pnand %p625_p0, %p622_p13 }
 0x112   :  { %630 = shalt.err (!%p627_p1)
}
 0x113   :  { %415 = dma.vmem_to_hbm [thread:$0]  %s410_s2, 1024, %s713_s3, [#allocation4], %s636_s22, %s636_s22, %s637_s23  }
 0x114   :  { %633 = dma.done.wait [#allocation4], 1024  }
 0x115   :  { %634 = vsyncadd [#allocation4], 4294966272 }
 0x116   :  { %419 = vsyncpa [#allocation3], 1 }
 0x117   :  { %420 = vsyncpa [#allocation4], 1 }

</bundles_post_ra>
